<compile_context>
chip_gen: v6e
topology: v6e:2x2x1
jax: 0.10.0
libtpu: 0.0.40
codegen_flags: <defaults>
</compile_context>

<pallas_src>
import functools

import jax
import jax.numpy as jnp
from jax.experimental import pallas as pl
from jax.experimental.pallas import tpu as pltpu

_LANE = 128     # lane width / MXU tile width
_SUBLANE = 8    # f32 sublane granularity


def _round_up(n, m):
    return ((n + m - 1) // m) * m


def _cdiv(a, b):
    return (a + b - 1) // b


def _resident_spec(shape):
    """Weight/bias spec: constant index_map => DMA'd once, VMEM-resident across
    the batch grid.  Single-buffered when the Pallas version supports it."""
    index_map = lambda i: (0, 0)
    try:
        return pl.BlockSpec(shape, index_map, pipeline_mode=pl.Buffered(1))
    except Exception:  # older Pallas: no pipeline_mode / Buffered -> default 2-buf
        return pl.BlockSpec(shape, index_map)


def _make_fcnet_kernel(num_layers, nonlinearity):
    act = jnp.tanh if nonlinearity == "tanh" else jax.nn.relu

    def kernel(x_ref, *refs):
        o_ref = refs[-1]
        wb = refs[:-1]
        h = x_ref[...]                               # (tb, obs_dim) f32 from HBM
        for i in range(num_layers):
            w = wb[2 * i][...]                       # (in_pad, out_pad), resident
            b = wb[2 * i + 1][...]                   # (1, out_pad) f32
            # Cast to the (possibly bf16) matmul dtype inside the kernel: free
            # VPU work hidden under DMA; accumulation stays f32 on the MXU.
            h = jnp.dot(h.astype(w.dtype), w, preferred_element_type=jnp.float32)
            h = h + b                                # bias + nonlinearity in f32
            if i < num_layers - 1:
                h = act(h)
        o_ref[...] = h.astype(o_ref.dtype)           # narrow (tb, act_dim) store

    return kernel


def prepare_fcnetwork_params(params, matmul_dtype=jnp.bfloat16):
    """One-time prep (call OUTSIDE the per-step forward): pad hidden feature dims
    to the 128-lane width (obs_dim / act_dim stay raw) and cast weights to the
    MXU operand dtype.  Biases stay f32.  Padded lanes are exact zeros and stay
    zero through tanh/relu, so results are unchanged."""
    ws = params[0::2]
    bs = params[1::2]
    dims = (ws[0].shape[0],) + tuple(w.shape[1] for w in ws)
    pdims = (dims[0],) + tuple(_round_up(d, _LANE) for d in dims[1:-1]) + (dims[-1],)
    out = []
    for i, (w, b) in enumerate(zip(ws, bs)):
        wp = jnp.pad(w, ((0, pdims[i] - dims[i]), (0, pdims[i + 1] - dims[i + 1])))
        bp = jnp.pad(jnp.reshape(b, (1, -1)),
                     ((0, 0), (0, pdims[i + 1] - dims[i + 1])))
        out += [wp.astype(matmul_dtype), bp.astype(jnp.float32)]
    return tuple(out)


@functools.partial(jax.jit, static_argnames=("nonlinearity", "block_batch"))
def fcnetwork_forward(x, prepared_params, nonlinearity="tanh", block_batch=2048):
    """x: (batch, obs_dim).  prepared_params: output of prepare_fcnetwork_params."""
    ws = prepared_params[0::2]
    bs = prepared_params[1::2]
    num_layers = len(ws)
    batch, obs_dim = x.shape
    if ws[0].shape[0] != obs_dim:
        raise ValueError("x feature dim does not match first layer weight")
    act_dim = ws[-1].shape[1]
    feat_dims = (obs_dim,) + tuple(w.shape[1] for w in ws)

    # Batch tiling: at least 2 grid steps when there's enough work (v7x has two
    # TensorCores), tile rounded to the 8-row sublane granularity, and batch
    # padded only up to that adaptive tile (no full-block_batch round-up).
    steps = max(2, _cdiv(batch, block_batch))
    tb = _round_up(_cdiv(batch, steps), _SUBLANE)
    pb = _round_up(batch, tb)
    grid = (pb // tb,)

    xp = jnp.pad(x, ((0, pb - batch), (0, 0))) if pb != batch else x

    # x / out streamed over the batch grid (lane dims = real feature dims,
    # legal because the last block dim equals the full array dim);
    # weights & biases VMEM-resident via constant index maps.
    in_specs = [pl.BlockSpec((tb, obs_dim), lambda i: (i, 0))]
    for li in range(num_layers):
        in_specs.append(_resident_spec(ws[li].shape))
        in_specs.append(_resident_spec(bs[li].shape))
    out_specs = pl.BlockSpec((tb, act_dim), lambda i: (i, 0))

    # Rough VMEM budget: double-buffered x/out tiles + (<=2x) resident weights
    # + one live f32 intermediate per layer.  Raise the scoped limit only when
    # the tile is pushed past the default comfort zone.
    wb_bytes = sum(int(a.size) * a.dtype.itemsize for a in prepared_params)
    est = (2 * tb * obs_dim * 4 + 2 * tb * act_dim * 4 + 2 * wb_bytes
           + sum(tb * d * 4 for d in feat_dims[1:]))
    vmem_limit = int(1.25 * est) if est > 24 * 1024 * 1024 else None

    kernel = _make_fcnet_kernel(num_layers, nonlinearity)

    out = pl.pallas_call(
        kernel,
        out_shape=jax.ShapeDtypeStruct((pb, act_dim), x.dtype),
        grid=grid,
        in_specs=in_specs,
        out_specs=out_specs,
        compiler_params=pltpu.CompilerParams(
            dimension_semantics=("parallel",),      # megacore split on v7x
            vmem_limit_bytes=vmem_limit),
    )(xp, *prepared_params)

    return out if pb == batch else out[:batch]


def init_fcnetwork_params(key, obs_dim, act_dim, hidden_sizes=(64, 64)):
    """Deterministic init mirroring nn.Linear default (uniform +/- 1/sqrt(fan_in))."""
    layer_sizes = (obs_dim,) + tuple(hidden_sizes) + (act_dim,)
    params = []
    for i in range(len(layer_sizes) - 1):
        fan_in, fan_out = layer_sizes[i], layer_sizes[i + 1]
        key, kw, kb = jax.random.split(key, 3)
        bound = 1.0 / (fan_in ** 0.5)
        # stored as (in, out) so kernel does x @ W  (== PyTorch x @ W.T + b)
        w = jax.random.uniform(kw, (fan_in, fan_out), jnp.float32, -bound, bound)
        b = jax.random.uniform(kb, (1, fan_out), jnp.float32, -bound, bound)
        params += [w, b]
    return tuple(params)


def fcnetwork_reference(x, params, nonlinearity="tanh"):
    """Pure-JAX reference of the PyTorch forward."""
    act = jnp.tanh if nonlinearity == "tanh" else jax.nn.relu
    ws = params[0::2]
    bs = params[1::2]
    h = x
    for i in range(len(ws) - 1):
        h = act(h @ ws[i] + bs[i])
    return h @ ws[-1] + bs[-1]


if __name__ == "__main__":
    obs_dim, act_dim, hidden = 32, 8, (64, 64)

    key = jax.random.PRNGKey(0)
    kx, kp, kx2 = jax.random.split(key, 3)
    params = init_fcnetwork_params(kp, obs_dim, act_dim, hidden)

    # --- small batch, f32 MXU operands (tight tolerance) ---
    x = jax.random.normal(kx, (2, obs_dim), jnp.float32)
    ref = fcnetwork_reference(x, params)
    pp_f32 = prepare_fcnetwork_params(params, matmul_dtype=jnp.float32)
    out = jax.block_until_ready(fcnetwork_forward(x, pp_f32))
    assert out.shape == (2, act_dim)
    assert jnp.allclose(out, ref, atol=1e-5, rtol=1e-5), "f32 path mismatch"

    # --- default bf16 MXU operands (f32 accumulate / bias / tanh) ---
    pp_bf16 = prepare_fcnetwork_params(params)     # bf16 default
    out_bf16 = jax.block_until_ready(fcnetwork_forward(x, pp_bf16))
    assert jnp.allclose(out_bf16, ref, atol=2e-2, rtol=2e-2), "bf16 path mismatch"

    # --- multi-step grid + partial last tile (batch not tile-aligned) ---
    x2 = jax.random.normal(kx2, (20, obs_dim), jnp.float32)
    ref2 = fcnetwork_reference(x2, params)
    out2 = jax.block_until_ready(fcnetwork_forward(x2, pp_f32, block_batch=8))
    assert out2.shape == (20, act_dim)
    assert jnp.allclose(out2, ref2, atol=1e-5, rtol=1e-5), "tiled path mismatch"

    print("KERNEL_OK")
</pallas_src>

<mosaic_0001>
module attributes {stable_mosaic.version = 11 : i64} {
  func.func @kernel(%arg0: i32, %arg1: memref<8x32xf32, #tpu.memory_space<vmem>>, %arg2: memref<32x128xf32, #tpu.memory_space<vmem>>, %arg3: memref<1x128xf32, #tpu.memory_space<vmem>>, %arg4: memref<128x128xf32, #tpu.memory_space<vmem>>, %arg5: memref<1x128xf32, #tpu.memory_space<vmem>>, %arg6: memref<128x8xf32, #tpu.memory_space<vmem>>, %arg7: memref<1x8xf32, #tpu.memory_space<vmem>>, %arg8: memref<8x8xf32, #tpu.memory_space<vmem>>) attributes {dimension_semantics = [#tpu.dimension_semantics<parallel>], iteration_bounds = array<i64: 1>, scalar_prefetch = 0 : i64, scratch_operands = 0 : i64, tpu.core_type = #tpu.core_type<tc>, window_params = [{transform_indices = @transform_0, window_bounds = array<i64: 8, 32>}, {pipeline_mode = #tpu.pipeline_mode<synchronous>, transform_indices = @transform_1, window_bounds = array<i64: 32, 128>}, {pipeline_mode = #tpu.pipeline_mode<synchronous>, transform_indices = @transform_2, window_bounds = array<i64: 1, 128>}, {pipeline_mode = #tpu.pipeline_mode<synchronous>, transform_indices = @transform_3, window_bounds = array<i64: 128, 128>}, {pipeline_mode = #tpu.pipeline_mode<synchronous>, transform_indices = @transform_4, window_bounds = array<i64: 1, 128>}, {pipeline_mode = #tpu.pipeline_mode<synchronous>, transform_indices = @transform_5, window_bounds = array<i64: 128, 8>}, {pipeline_mode = #tpu.pipeline_mode<synchronous>, transform_indices = @transform_6, window_bounds = array<i64: 1, 8>}, {transform_indices = @transform_7, window_bounds = array<i64: 8, 8>}]} {
    %c0 = arith.constant 0 : index
    %c0_0 = arith.constant 0 : index
    %0 = vector.load %arg1[%c0, %c0_0] : memref<8x32xf32, #tpu.memory_space<vmem>>, vector<8x32xf32>
    %c0_1 = arith.constant 0 : index
    %c0_2 = arith.constant 0 : index
    %1 = vector.load %arg2[%c0_1, %c0_2] : memref<32x128xf32, #tpu.memory_space<vmem>>, vector<32x128xf32>
    %c0_3 = arith.constant 0 : index
    %c0_4 = arith.constant 0 : index
    %2 = vector.load %arg3[%c0_3, %c0_4] : memref<1x128xf32, #tpu.memory_space<vmem>>, vector<1x128xf32>
    %cst = arith.constant dense<0.000000e+00> : vector<8x128xf32>
    %3 = tpu.matmul %0, %1, %cst {dimension_numbers = #tpu.dot_dimension_numbers<[1], [0], [0], [1], [0, 0, 1, 1], [], []>} : vector<8x32xf32>, vector<32x128xf32>, vector<8x128xf32> -> vector<8x128xf32>
    %4 = vector.broadcast %2 : vector<1x128xf32> to vector<8x128xf32>
    %5 = arith.addf %3, %4 : vector<8x128xf32>
    %6 = math.tanh %5 : vector<8x128xf32>
    %c0_5 = arith.constant 0 : index
    %c0_6 = arith.constant 0 : index
    %7 = vector.load %arg4[%c0_5, %c0_6] : memref<128x128xf32, #tpu.memory_space<vmem>>, vector<128x128xf32>
    %c0_7 = arith.constant 0 : index
    %c0_8 = arith.constant 0 : index
    %8 = vector.load %arg5[%c0_7, %c0_8] : memref<1x128xf32, #tpu.memory_space<vmem>>, vector<1x128xf32>
    %cst_9 = arith.constant dense<0.000000e+00> : vector<8x128xf32>
    %9 = tpu.matmul %6, %7, %cst_9 {dimension_numbers = #tpu.dot_dimension_numbers<[1], [0], [0], [1], [0, 0, 1, 1], [], []>} : vector<8x128xf32>, vector<128x128xf32>, vector<8x128xf32> -> vector<8x128xf32>
    %10 = vector.broadcast %8 : vector<1x128xf32> to vector<8x128xf32>
    %11 = arith.addf %9, %10 : vector<8x128xf32>
    %12 = math.tanh %11 : vector<8x128xf32>
    %c0_10 = arith.constant 0 : index
    %c0_11 = arith.constant 0 : index
    %13 = vector.load %arg6[%c0_10, %c0_11] : memref<128x8xf32, #tpu.memory_space<vmem>>, vector<128x8xf32>
    %c0_12 = arith.constant 0 : index
    %c0_13 = arith.constant 0 : index
    %14 = vector.load %arg7[%c0_12, %c0_13] : memref<1x8xf32, #tpu.memory_space<vmem>>, vector<1x8xf32>
    %cst_14 = arith.constant dense<0.000000e+00> : vector<8x8xf32>
    %15 = tpu.matmul %12, %13, %cst_14 {dimension_numbers = #tpu.dot_dimension_numbers<[1], [0], [0], [1], [0, 0, 1, 1], [], []>} : vector<8x128xf32>, vector<128x8xf32>, vector<8x8xf32> -> vector<8x8xf32>
    %16 = vector.broadcast %14 : vector<1x8xf32> to vector<8x8xf32>
    %17 = arith.addf %15, %16 : vector<8x8xf32>
    %c0_15 = arith.constant 0 : index
    %c0_16 = arith.constant 0 : index
    %18 = vector.load %arg8[%c0_15, %c0_16] : memref<8x8xf32, #tpu.memory_space<vmem>>, vector<8x8xf32>
    tpu.vector_store %arg8[%c0_15, %c0_16], %17 {strides = array<i32>} : memref<8x8xf32, #tpu.memory_space<vmem>>, vector<8x8xf32>,
    return
  }
  func.func @transform_0(%arg0: i32) -> (i32, i32) {
    %c0_i32 = arith.constant 0 : i32
    %c0_i32_0 = arith.constant 0 : i32
    return %arg0, %c0_i32 : i32, i32
  }
  func.func @transform_1(%arg0: i32) -> (i32, i32) {
    %c0_i32 = arith.constant 0 : i32
    %c0_i32_0 = arith.constant 0 : i32
    %c0_i32_1 = arith.constant 0 : i32
    return %c0_i32, %c0_i32_0 : i32, i32
  }
  func.func @transform_2(%arg0: i32) -> (i32, i32) {
    %c0_i32 = arith.constant 0 : i32
    %c0_i32_0 = arith.constant 0 : i32
    %c0_i32_1 = arith.constant 0 : i32
    return %c0_i32, %c0_i32_0 : i32, i32
  }
  func.func @transform_3(%arg0: i32) -> (i32, i32) {
    %c0_i32 = arith.constant 0 : i32
    %c0_i32_0 = arith.constant 0 : i32
    %c0_i32_1 = arith.constant 0 : i32
    return %c0_i32, %c0_i32_0 : i32, i32
  }
  func.func @transform_4(%arg0: i32) -> (i32, i32) {
    %c0_i32 = arith.constant 0 : i32
    %c0_i32_0 = arith.constant 0 : i32
    %c0_i32_1 = arith.constant 0 : i32
    return %c0_i32, %c0_i32_0 : i32, i32
  }
  func.func @transform_5(%arg0: i32) -> (i32, i32) {
    %c0_i32 = arith.constant 0 : i32
    %c0_i32_0 = arith.constant 0 : i32
    %c0_i32_1 = arith.constant 0 : i32
    return %c0_i32, %c0_i32_0 : i32, i32
  }
  func.func @transform_6(%arg0: i32) -> (i32, i32) {
    %c0_i32 = arith.constant 0 : i32
    %c0_i32_0 = arith.constant 0 : i32
    %c0_i32_1 = arith.constant 0 : i32
    return %c0_i32, %c0_i32_0 : i32, i32
  }
  func.func @transform_7(%arg0: i32) -> (i32, i32) {
    %c0_i32 = arith.constant 0 : i32
    %c0_i32_0 = arith.constant 0 : i32
    return %arg0, %c0_i32 : i32, i32
  }
}

</mosaic_0001>

<bundles_post_ra>
// kernel: fcnetwork_forward.1
= control target key start
LH: loop header
LB: loop body
LE: loop exit
PB: predicated region body
PF: predicated region fallthrough
CT: control target
= control target key end

     0   :  { %12 = vsyncpa [#allocation3], 0  ;;  %s476_s24 = smov [#allocation2]   ;;  %s677_s0 = inlined_call_operand.vmem [shape: f32[8,32], index: 0, kind: input, shape index: {}]   ;;  %s678_s1 = inlined_call_operand.hbm [shape: f32[32,128], index: 1, kind: input, shape index: {}]   ;;  %s679_s2 = inlined_call_operand.vmem [shape: f32[1,128], index: 2, kind: input, shape index: {}]   ;;  %s680_s3 = inlined_call_operand.vmem [shape: f32[128,128], index: 3, kind: input, shape index: {}]   ;;  %s681_s4 = inlined_call_operand.vmem [shape: f32[1,128], index: 4, kind: input, shape index: {}]   ;;  %s682_s5 = inlined_call_operand.vmem [shape: f32[128,8], index: 5, kind: input, shape index: {}]   ;;  %s683_s6 = inlined_call_operand.vmem [shape: f32[1,8], index: 6, kind: input, shape index: {}]   ;;  %s684_s7 = inlined_call_operand.vmem [shape: f32[8,8], index: 7, kind: output, shape index: {}]  }
   0x1   :  { %s20_s25 = sshll.u32 %s476_s24, 4  ;;  %s21_s25 = int_to_ptr.vmem [resolvable:$true] %s20_s25 }
   0x2   :  { %s462_s26 = scalar_lea.vmem %s21_s25, 512  ;;  %p467_p1 = scmp.lt.s32.totalorder %s21_s25, %s21_s25 }
   0x3   :  { %p463_p0 = scmp.ne.s32.totalorder %s21_s25, %s462_s26  ;;  %p468_p2 = scmp.lt.s32.totalorder %s462_s26, %s462_s26 }
   0x5   :  { %p469_p3 = por %p468_p2, %p467_p1 }
   0x7   :  { %p470_p4 = pnand %p469_p3, %p463_p0 }
   0x9   :  { %473 = shalt.err (!%p470_p4)
}
   0xa   :  { %s477_s27 = smov 128   ;;  %s478_s28 = smov 8  }
   0xb   :  { %26 = dma.hbm_to_vmem [thread:$0]  %s678_s1, 512, %s21_s25, [#allocation3], %s477_s27, %s477_s27, %s478_s28  }
   0xc   :  { %474 = dma.done.wait [#allocation3], 512  }
   0xd   :  { %475 = vsyncadd [#allocation3], 4294966784  ;;  %v479_v0 = vmov 0.0   ;;  %vm480_vm0 = vmmov 0   ;;  %v44_v1 = vld [vmem:[#allocation2 + $0x18] sm:$0xff]  ;;  %v43_v2 = vld [vmem:[#allocation2 + $0x10] sm:$0xff] }
   0xe   :  { %364 = vmatprep.subr.mxu0 %v479_v0  ;;  %372 = vmatprep.mubr.msk.f32.mxu0 %vm480_vm0, %v479_v0  ;;  %v142_v3 = vld [vmem:[%s680_s3 + $0x78] sm:$0xff]  ;;  %v42_v4 = vld [vmem:[#allocation2 + $0x8] sm:$0xff]  ;;  %v141_v5 = vld [vmem:[%s680_s3 + $0x70] sm:$0xff]  ;;  %vm52_vm1 = vcmask 261120   ;;  %vm314_vm2 = vcmask 64512  }
   0xf   :  { %375 = vmatprep.subr.mxu1 %v479_v0  ;;  %407 = vmatprep.mubr.msk.f32.mxu1 %vm480_vm0, %v479_v0  ;;  %v140_v6 = vld [vmem:[%s680_s3 + $0x68] sm:$0xff]  ;;  %v41_v7 = vld [vmem:[#allocation2] sm:$0xff]  ;;  %v138_v10 = vld [vmem:[%s680_s3 + $0x58] sm:$0xff] }
  0x10   :  { %365 = vmatpush3.msra.mxu0 %v44_v1  ;;  %376 = vmatpush3.msra.mxu1 %v142_v3  ;;  %v40_v8 = vld [vmem:[%s677_s0] sm:$0xff]  ;;  %v137_v11 = vld [vmem:[%s680_s3 + $0x50] sm:$0xff]  ;;  %v136_v12 = vld [vmem:[%s680_s3 + $0x48] sm:$0xff] }
  0x11   :  { %366 = vmatprep.subr.mxu0 %v479_v0  ;;  %377 = vmatprep.subr.mxu1 %v479_v0  ;;  %v139_v9 = vld [vmem:[%s680_s3 + $0x60] sm:$0xff]  ;;  %v134_v14 = vld [vmem:[%s680_s3 + $0x38] sm:$0xff]  ;;  %v133_v15 = vld [vmem:[%s680_s3 + $0x30] sm:$0xff] }
  0x12   :  { %367 = vmatpush3.msra.mxu0 %v43_v2  ;;  %378 = vmatpush3.msra.mxu1 %v141_v5  ;;  %v135_v13 = vld [vmem:[%s680_s3 + $0x40] sm:$0xff]  ;;  %v132_v16 = vld [vmem:[%s680_s3 + $0x28] sm:$0xff]  ;;  %v130_v18 = vld [vmem:[%s680_s3 + $0x18] sm:$0xff] }
  0x13   :  { %368 = vmatprep.subr.mxu0 %v479_v0  ;;  %379 = vmatprep.subr.mxu1 %v479_v0  ;;  %v131_v17 = vld [vmem:[%s680_s3 + $0x20] sm:$0xff]  ;;  %v129_v19 = vld [vmem:[%s680_s3 + $0x10] sm:$0xff]  ;;  %v128_v20 = vld [vmem:[%s680_s3 + $0x8] sm:$0xff] }
  0x14   :  { %369 = vmatpush3.msra.mxu0 %v42_v4  ;;  %380 = vmatpush3.msra.mxu1 %v140_v6  ;;  %v127_v21 = vld [vmem:[%s680_s3] sm:$0xff]  ;;  %v236_v22 = vld [vmem:[%s682_s5 + $0x78] sm:$0xff]  ;;  %v235_v23 = vld [vmem:[%s682_s5 + $0x70] sm:$0xff] }
  0x15   :  { %370 = vmatprep.subr.mxu0 %v479_v0  ;;  %381 = vmatprep.subr.mxu1 %v479_v0  ;;  %v234_v24 = vld [vmem:[%s682_s5 + $0x68] sm:$0xff]  ;;  %v233_v25 = vld [vmem:[%s682_s5 + $0x60] sm:$0xff]  ;;  %v232_v26 = vld [vmem:[%s682_s5 + $0x58] sm:$0xff] }
  0x16   :  { %371 = vmatpush3.msra.mxu0 %v41_v7  ;;  %382 = vmatpush3.msra.mxu1 %v139_v9  ;;  %v231_v27 = vld [vmem:[%s682_s5 + $0x50] sm:$0xff]  ;;  %v230_v28 = vld [vmem:[%s682_s5 + $0x48] sm:$0xff]  ;;  %v321_v29 = vld [vmem:[%s679_s2] ss:$0 sm:$0xff] }
  0x17   :  { %373 = vmatmul.mubr.msk.f32.vlgmr.msra.gmra.mxu0 %vm52_vm1, %v40_v8  ;;  %383 = vmatprep.subr.mxu1 %v479_v0  ;;  %v229_v34 = vld [vmem:[%s682_s5 + $0x40] sm:$0xff]  ;;  %v228_v35 = vld [vmem:[%s682_s5 + $0x38] sm:$0xff]  ;;  %v227_v36 = vld [vmem:[%s682_s5 + $0x30] sm:$0xff] }
  0x18   :  { %410 = vmatprep.subr.mxu0 %v479_v0  ;;  %384 = vmatpush3.msra.mxu1 %v138_v10  ;;  %v226_v37 = vld [vmem:[%s682_s5 + $0x28] sm:$0xff]  ;;  %v225_v38 = vld [vmem:[%s682_s5 + $0x20] sm:$0xff]  ;;  %v224_v39 = vld [vmem:[%s682_s5 + $0x18] sm:$0xff] }
  0x19   :  { %442 = vmatprep.mubr.msk.f32.mxu0 %vm480_vm0, %v479_v0  ;;  %385 = vmatprep.subr.mxu1 %v479_v0  ;;  %v223_v40 = vld [vmem:[%s682_s5 + $0x10] sm:$0xff]  ;;  %v222_v41 = vld [vmem:[%s682_s5 + $0x8] sm:$0xff]  ;;  %v221_v42 = vld [vmem:[%s682_s5] sm:$0xff] }
  0x1a   :  { %386 = vmatpush3.msra.mxu1 %v137_v11  ;;  %411 = vmatpush3.msra.mxu0 %v236_v22  ;;  %v323_v43 = vld [vmem:[%s681_s4] ss:$0 sm:$0xff] }
  0x1b   :  { %387 = vmatprep.subr.mxu1 %v479_v0  ;;  %412 = vmatprep.subr.mxu0 %v479_v0  ;;  %v324_v48 = vld [vmem:[%s683_s6] ss:$0 sm:$0xff] }
  0x1c   :  { %388 = vmatpush3.msra.mxu1 %v136_v12  ;;  %413 = vmatpush3.msra.mxu0 %v235_v23 }
  0x1d   :  { %389 = vmatprep.subr.mxu1 %v479_v0  ;;  %414 = vmatprep.subr.mxu0 %v479_v0 }
  0x1e   :  { %390 = vmatpush3.msra.mxu1 %v135_v13  ;;  %415 = vmatpush3.msra.mxu0 %v234_v24 }
  0x1f   :  { %391 = vmatprep.subr.mxu1 %v479_v0  ;;  %416 = vmatprep.subr.mxu0 %v479_v0 }
  0x20   :  { %392 = vmatpush3.msra.mxu1 %v134_v14  ;;  %417 = vmatpush3.msra.mxu0 %v233_v25 }
  0x21   :  { %393 = vmatprep.subr.mxu1 %v479_v0  ;;  %418 = vmatprep.subr.mxu0 %v479_v0 }
  0x22   :  { %394 = vmatpush3.msra.mxu1 %v133_v15  ;;  %419 = vmatpush3.msra.mxu0 %v232_v26 }
  0x23   :  { %395 = vmatprep.subr.mxu1 %v479_v0  ;;  %420 = vmatprep.subr.mxu0 %v479_v0 }
  0x24   :  { %396 = vmatpush3.msra.mxu1 %v132_v16  ;;  %421 = vmatpush3.msra.mxu0 %v231_v27 }
  0x25   :  { %397 = vmatprep.subr.mxu1 %v479_v0  ;;  %422 = vmatprep.subr.mxu0 %v479_v0 }
  0x26   :  { %398 = vmatpush3.msra.mxu1 %v131_v17  ;;  %423 = vmatpush3.msra.mxu0 %v230_v28 }
  0x27   :  { %399 = vmatprep.subr.mxu1 %v479_v0  ;;  %424 = vmatprep.subr.mxu0 %v479_v0 }
  0x28   :  { %400 = vmatpush3.msra.mxu1 %v130_v18  ;;  %425 = vmatpush3.msra.mxu0 %v229_v34 }
  0x29   :  { %401 = vmatprep.subr.mxu1 %v479_v0  ;;  %426 = vmatprep.subr.mxu0 %v479_v0 }
  0x2a   :  { %402 = vmatpush3.msra.mxu1 %v129_v19  ;;  %427 = vmatpush3.msra.mxu0 %v228_v35 }
  0x2b   :  { %403 = vmatprep.subr.mxu1 %v479_v0  ;;  %428 = vmatprep.subr.mxu0 %v479_v0 }
  0x2c   :  { %404 = vmatpush3.msra.mxu1 %v128_v20  ;;  %429 = vmatpush3.msra.mxu0 %v227_v36 }
  0x2d   :  { %405 = vmatprep.subr.mxu1 %v479_v0  ;;  %430 = vmatprep.subr.mxu0 %v479_v0 }
  0x2e   :  { %406 = vmatpush3.msra.mxu1 %v127_v21  ;;  %431 = vmatpush3.msra.mxu0 %v226_v37 }
  0x2f   :  { %432 = vmatprep.subr.mxu0 %v479_v0 }
  0x30   :  { %433 = vmatpush3.msra.mxu0 %v225_v38 }
  0x31   :  { %434 = vmatprep.subr.mxu0 %v479_v0 }
  0x32   :  { %435 = vmatpush3.msra.mxu0 %v224_v39 }
  0x33   :  { %436 = vmatprep.subr.mxu0 %v479_v0 }
  0x34   :  { %437 = vmatpush3.msra.mxu0 %v223_v40 }
  0x35   :  { %438 = vmatprep.subr.mxu0 %v479_v0 }
  0x36   :  { %439 = vmatpush3.msra.mxu0 %v222_v41 }
  0x37   :  { %440 = vmatprep.subr.mxu0 %v479_v0 }
  0x38   :  { %441 = vmatpush3.msra.mxu0 %v221_v42 }
  0xd7   :  { %v122_v30 = vpop.f32.mrf.mxu0 }
  0xd8   :  { %v123_v31 = vadd.f32 %v321_v29, %v122_v30 }
  0xd9   :  { %v374_v32 = vpop.f32.mrf.mxu0 }
  0xda   :  { %450 = vtanh.f32 %v123_v31 }
  0xe7   :  { %v451_v33 = vpop.eup %450 }
  0xe8   :  { %408 = vmatmul.mubr.f32.vlgmr.msra.gmra.mxu1 %v451_v33 }
 0x1a8   :  { %v216_v44 = vpop.f32.mrf.mxu1 }
 0x1a9   :  { %v217_v45 = vadd.f32 %v323_v43, %v216_v44 }
 0x1aa   :  { %v409_v46 = vpop.f32.mrf.mxu1 }
 0x1ab   :  { %452 = vtanh.f32 %v217_v45 }
 0x1b8   :  { %v453_v47 = vpop.eup %452 }
 0x1b9   :  { %443 = vmatmul.mubr.f32.vlgmr.msra.gmra.mxu0 %v453_v47 }
 0x279   :  { %v310_v49 = vpop.f32.mrf.mxu0 }
 0x27a   :  { %v311_v50 = vadd.f32 %v324_v48, %v310_v49 }
 0x27b   :  { %v444_v51 = vpop.f32.mrf.mxu0 }
 0x27c   :  { %315 = vst.msk [vmem:[%s684_s7] sm:$0xff] %vm314_vm2, %v311_v50 }
 0x27d   :  { %320 = vsyncpa [#allocation3], 1 }

</bundles_post_ra>
